<compile_context>
chip_gen: v5e
topology: v5e:2x2
jax: 0.10.0
libtpu: 0.0.40
codegen_flags: <defaults>
</compile_context>

<pallas_src>
import math
from functools import partial

import jax
import jax.numpy as jnp
import numpy as np
from jax.experimental import pallas as pl
from jax.experimental.pallas import tpu as pltpu


# ----------------------------- Pallas kernels -----------------------------

def _attn_kernel(q_ref, k_ref, v_ref, o_ref, *, scale):
    # q: (G, Sq, dk), k: (G, Sk, dk), v: (G, Sk, dv)
    q = q_ref[...]
    k = k_ref[...]
    v = v_ref[...]
    # batched matmul contracting on the last dims (no explicit transpose)
    s = jax.lax.dot_general(
        q, k, (((2,), (2,)), ((0,), (0,))),
        preferred_element_type=jnp.float32) * scale
    m = jnp.max(s, axis=-1, keepdims=True)
    p = jnp.exp(s - m)
    denom = jnp.sum(p, axis=-1, keepdims=True)
    p = p * pl.reciprocal(denom)            # multiply by exact reciprocal
    # NOTE: dropout on attention weights is identity in eval mode.
    o = jax.lax.dot_general(
        p, v, (((2,), (1,)), ((0,), (0,))),
        preferred_element_type=jnp.float32)
    o_ref[...] = o.astype(o_ref.dtype)


def _attn_mask_kernel(q_ref, k_ref, v_ref, m_ref, o_ref, *, scale):
    q = q_ref[...]
    k = k_ref[...]
    v = v_ref[...]
    s = jax.lax.dot_general(
        q, k, (((2,), (2,)), ((0,), (0,))),
        preferred_element_type=jnp.float32) * scale
    # masked_fill(mask == 0, -inf)
    s = jnp.where(m_ref[...] == 0, -jnp.inf, s)
    mx = jnp.max(s, axis=-1, keepdims=True)
    p = jnp.exp(s - mx)
    denom = jnp.sum(p, axis=-1, keepdims=True)
    p = p * pl.reciprocal(denom)
    o = jax.lax.dot_general(
        p, v, (((2,), (1,)), ((0,), (0,))),
        preferred_element_type=jnp.float32)
    o_ref[...] = o.astype(o_ref.dtype)


# ----------------------------- wrapper -----------------------------

def attention(q, k, v, mask=None, *, dim_k=None, max_group=8):
    """Scaled dot-product attention.

    q: (..., Sq, dk), k: (..., Sk, dk), v: (..., Sk, dv)
    mask: optional, broadcastable to (..., Sq, Sk); entries == 0 are masked out.
    """
    lead = q.shape[:-2]
    Sq, dk = q.shape[-2:]
    Sk = k.shape[-2]
    dv = v.shape[-1]
    if dim_k is None:
        dim_k = dk
    BH = int(np.prod(lead)) if lead else 1

    qf = q.reshape(BH, Sq, dk)
    kf = k.reshape(BH, Sk, dk)
    vf = v.reshape(BH, Sk, dv)
    scale = 1.0 / math.sqrt(dim_k)

    # Process up to `max_group` (batch*head) slices per grid step -> fewer,
    # larger grid steps instead of one tiny slice per step.
    G = 1
    for g in range(min(max_group, BH), 0, -1):
        if BH % g == 0:
            G = g
            break
    grid = (BH // G,)

    q_spec = pl.BlockSpec((G, Sq, dk), lambda i: (i, 0, 0))
    k_spec = pl.BlockSpec((G, Sk, dk), lambda i: (i, 0, 0))
    v_spec = pl.BlockSpec((G, Sk, dv), lambda i: (i, 0, 0))
    o_spec = pl.BlockSpec((G, Sq, dv), lambda i: (i, 0, 0))
    cparams = pltpu.CompilerParams(dimension_semantics=("parallel",))
    out_shape = jax.ShapeDtypeStruct((BH, Sq, dv), jnp.float32)

    if mask is None:
        out = pl.pallas_call(
            partial(_attn_kernel, scale=scale),
            out_shape=out_shape,
            grid=grid,
            in_specs=[q_spec, k_spec, v_spec],
            out_specs=o_spec,
            compiler_params=cparams,
        )(qf, kf, vf)
    else:
        mf = jnp.broadcast_to(mask, lead + (Sq, Sk)).reshape(BH, Sq, Sk)
        mf = mf.astype(jnp.int32)
        m_spec = pl.BlockSpec((G, Sq, Sk), lambda i: (i, 0, 0))
        out = pl.pallas_call(
            partial(_attn_mask_kernel, scale=scale),
            out_shape=out_shape,
            grid=grid,
            in_specs=[q_spec, k_spec, v_spec, m_spec],
            out_specs=o_spec,
            compiler_params=cparams,
        )(qf, kf, vf, mf)

    return out.reshape(lead + (Sq, dv))


# ----------------------------- pure-JAX reference -----------------------------

def attention_ref(q, k, v, mask=None, dim_k=None):
    if dim_k is None:
        dim_k = q.shape[-1]
    s = jnp.einsum("...qd,...kd->...qk", q, k) / math.sqrt(dim_k)
    if mask is not None:
        s = jnp.where(mask == 0, -jnp.inf, s)
    p = jax.nn.softmax(s, axis=-1)
    return jnp.einsum("...qk,...kd->...qd", p, v)


# ----------------------------- main -----------------------------

if __name__ == "__main__":
    B, H, S, dim_k, dim_v = 2, 4, 8, 64, 128
    key = jax.random.PRNGKey(0)
    kq, kk, kv = jax.random.split(key, 3)
    q = jax.random.normal(kq, (B, H, S, dim_k), jnp.float32)
    k = jax.random.normal(kk, (B, H, S, dim_k), jnp.float32)
    v = jax.random.normal(kv, (B, H, S, dim_v), jnp.float32)

    # unmasked path
    out = attention(q, k, v, dim_k=dim_k)
    out = jax.block_until_ready(out)
    ref = attention_ref(q, k, v, dim_k=dim_k)
    assert out.shape == (B, H, S, dim_v)
    assert jnp.allclose(out, ref, rtol=1e-4, atol=1e-4), "unmasked mismatch"

    # masked path (causal mask, broadcast over heads; every row keeps >=1 entry)
    mask = jnp.tril(jnp.ones((S, S), jnp.int32)).reshape(1, 1, S, S)
    out_m = attention(q, k, v, mask=mask, dim_k=dim_k)
    out_m = jax.block_until_ready(out_m)
    ref_m = attention_ref(q, k, v, mask=mask, dim_k=dim_k)
    assert jnp.allclose(out_m, ref_m, rtol=1e-4, atol=1e-4), "masked mismatch"

    print("KERNEL_OK")
</pallas_src>

<mosaic_0001>
module attributes {stable_mosaic.version = 11 : i64} {
  func.func @_attn_kernel(%arg0: i32, %arg1: memref<8x8x64xf32, #tpu.memory_space<vmem>>, %arg2: memref<8x8x64xf32, #tpu.memory_space<vmem>>, %arg3: memref<8x8x128xf32, #tpu.memory_space<vmem>>, %arg4: memref<8x8x128xf32, #tpu.memory_space<vmem>>) attributes {dimension_semantics = [#tpu.dimension_semantics<parallel>], iteration_bounds = array<i64: 1>, scalar_prefetch = 0 : i64, scratch_operands = 0 : i64, tpu.core_type = #tpu.core_type<tc>, window_params = [{transform_indices = @transform_0, window_bounds = array<i64: 8, 8, 64>}, {transform_indices = @transform_1, window_bounds = array<i64: 8, 8, 64>}, {transform_indices = @transform_2, window_bounds = array<i64: 8, 8, 128>}, {transform_indices = @transform_3, window_bounds = array<i64: 8, 8, 128>}]} {
    %c0 = arith.constant 0 : index
    %c0_0 = arith.constant 0 : index
    %c0_1 = arith.constant 0 : index
    %0 = vector.load %arg1[%c0, %c0_0, %c0_1] : memref<8x8x64xf32, #tpu.memory_space<vmem>>, vector<8x8x64xf32>
    %c0_2 = arith.constant 0 : index
    %c0_3 = arith.constant 0 : index
    %c0_4 = arith.constant 0 : index
    %1 = vector.load %arg2[%c0_2, %c0_3, %c0_4] : memref<8x8x64xf32, #tpu.memory_space<vmem>>, vector<8x8x64xf32>
    %c0_5 = arith.constant 0 : index
    %c0_6 = arith.constant 0 : index
    %c0_7 = arith.constant 0 : index
    %2 = vector.load %arg3[%c0_5, %c0_6, %c0_7] : memref<8x8x128xf32, #tpu.memory_space<vmem>>, vector<8x8x128xf32>
    %cst = arith.constant dense<0.000000e+00> : vector<8x8x8xf32>
    %3 = tpu.matmul %0, %1, %cst {dimension_numbers = #tpu.dot_dimension_numbers<[2], [2], [1], [1], [0, 0, 0, 1, 1, 1], [0], [0]>} : vector<8x8x64xf32>, vector<8x8x64xf32>, vector<8x8x8xf32> -> vector<8x8x8xf32>
    %cst_8 = arith.constant 1.250000e-01 : f32
    %4 = vector.broadcast %cst_8 : f32 to vector<8x8x8xf32>
    %5 = arith.mulf %3, %4 : vector<8x8x8xf32>
    %cst_9 = arith.constant dense<0xFF800000> : vector<8x8xf32>
    %6 = vector.multi_reduction <maximumf>, %5, %cst_9 [2] : vector<8x8x8xf32> to vector<8x8xf32>
    %7 = vector.shape_cast %6 : vector<8x8xf32> to vector<8x8x1xf32>
    %8 = vector.broadcast %7 : vector<8x8x1xf32> to vector<8x8x8xf32>
    %9 = arith.subf %5, %8 : vector<8x8x8xf32>
    %10 = math.exp %9 : vector<8x8x8xf32>
    %cst_10 = arith.constant dense<0.000000e+00> : vector<8x8xf32>
    %11 = vector.multi_reduction <add>, %10, %cst_10 [2] : vector<8x8x8xf32> to vector<8x8xf32>
    %12 = vector.shape_cast %11 : vector<8x8xf32> to vector<8x8x1xf32>
    %13 = tpu.reciprocal %12 : vector<8x8x1xf32> -> vector<8x8x1xf32>
    %14 = vector.broadcast %13 : vector<8x8x1xf32> to vector<8x8x8xf32>
    %15 = arith.mulf %10, %14 : vector<8x8x8xf32>
    %cst_11 = arith.constant dense<0.000000e+00> : vector<8x8x128xf32>
    %16 = tpu.matmul %15, %2, %cst_11 {dimension_numbers = #tpu.dot_dimension_numbers<[2], [1], [1], [2], [0, 0, 0, 1, 1, 2], [0], [0]>} : vector<8x8x8xf32>, vector<8x8x128xf32>, vector<8x8x128xf32> -> vector<8x8x128xf32>
    %c0_12 = arith.constant 0 : index
    %c0_13 = arith.constant 0 : index
    %c0_14 = arith.constant 0 : index
    %17 = vector.load %arg4[%c0_12, %c0_13, %c0_14] : memref<8x8x128xf32, #tpu.memory_space<vmem>>, vector<8x8x128xf32>
    tpu.vector_store %arg4[%c0_12, %c0_13, %c0_14], %16 {strides = array<i32>} : memref<8x8x128xf32, #tpu.memory_space<vmem>>, vector<8x8x128xf32>,
    return
  }
  func.func @transform_0(%arg0: i32) -> (i32, i32, i32) {
    %c0_i32 = arith.constant 0 : i32
    %c0_i32_0 = arith.constant 0 : i32
    %c0_i32_1 = arith.constant 0 : i32
    return %arg0, %c0_i32, %c0_i32_0 : i32, i32, i32
  }
  func.func @transform_1(%arg0: i32) -> (i32, i32, i32) {
    %c0_i32 = arith.constant 0 : i32
    %c0_i32_0 = arith.constant 0 : i32
    %c0_i32_1 = arith.constant 0 : i32
    return %arg0, %c0_i32, %c0_i32_0 : i32, i32, i32
  }
  func.func @transform_2(%arg0: i32) -> (i32, i32, i32) {
    %c0_i32 = arith.constant 0 : i32
    %c0_i32_0 = arith.constant 0 : i32
    %c0_i32_1 = arith.constant 0 : i32
    return %arg0, %c0_i32, %c0_i32_0 : i32, i32, i32
  }
  func.func @transform_3(%arg0: i32) -> (i32, i32, i32) {
    %c0_i32 = arith.constant 0 : i32
    %c0_i32_0 = arith.constant 0 : i32
    %c0_i32_1 = arith.constant 0 : i32
    return %arg0, %c0_i32, %c0_i32_0 : i32, i32, i32
  }
}

</mosaic_0001>

<bundles_post_ra>
// kernel: tpu_custom_call.1
= control target key start
LH: loop header
LB: loop body
LE: loop exit
PB: predicated region body
PF: predicated region fallthrough
CT: control target
= control target key end

     0   :  { %8 = vsyncpa [#allocation3], 0  ;;  %s1039_s0 = inlined_call_operand.hbm [shape: f32[8,8,64], index: 0, kind: input, shape index: {}]   ;;  %s1040_s1 = inlined_call_operand.hbm [shape: f32[8,8,64], index: 1, kind: input, shape index: {}]   ;;  %s1041_s2 = inlined_call_operand.hbm [shape: f32[8,8,128], index: 2, kind: input, shape index: {}]   ;;  %s1042_s3 = inlined_call_operand.hbm [shape: f32[8,8,128], index: 3, kind: output, shape index: {}]  }
   0x1   :  { %9 = vsyncpa [#allocation6], 0 }
   0x2   :  { %10 = vsyncpa [#allocation4], 0  ;;  %s28_s14 = sshll.u32 %s1040_s1, 4  ;;  %s872_s15 = smov [#allocation5]   ;;  %s29_s14 = int_to_ptr.hbm [resolvable:$true] %s28_s14 }
   0x3   :  { %s30_s16 = sshll.u32 %s872_s15, 4  ;;  %s15_s19 = sshll.u32 %s1039_s0, 4  ;;  %s31_s16 = int_to_ptr.vmem [resolvable:$true] %s30_s16  ;;  %s16_s19 = int_to_ptr.hbm [resolvable:$true] %s15_s19 }
   0x4   :  { %s873_s20 = smov 128   ;;  %s874_s21 = smov 8  }
   0x5   :  { %36 = dma.hbm_to_vmem [thread:$0]  %s29_s14, 1024, %s31_s16, [#allocation6], %s873_s20, %s873_s20, %s874_s21  }
   0x6   :  { %s875_s22 = smov [#allocation2]   ;;  %s41_s1 = sshll.u32 %s1041_s2, 4  ;;  %s42_s1 = int_to_ptr.hbm [resolvable:$true] %s41_s1 }
   0x7   :  { %s17_s23 = sshll.u32 %s875_s22, 4  ;;  %s876_s0 = smov [#allocation7]   ;;  %s18_s23 = int_to_ptr.vmem [resolvable:$true] %s17_s23 }
   0x8   :  { %23 = dma.hbm_to_vmem [thread:$0]  %s16_s19, 1024, %s18_s23, [#allocation3], %s873_s20, %s873_s20, %s874_s21  }
   0x9   :  { %s43_s26 = sshll.u32 %s876_s0, 4  ;;  %s44_s26 = int_to_ptr.vmem [resolvable:$true] %s43_s26 }
   0xa   :  { %49 = dma.hbm_to_vmem [thread:$0]  %s42_s1, 1024, %s44_s26, [#allocation6], %s873_s20, %s873_s20, %s874_s21  }
   0xb   :  { %866 = dma.done.wait [#allocation3], 1024  }
   0xc   :  { %867 = vsyncadd [#allocation3], 4294966272 }
   0xd   :  { %868 = dma.done.wait [#allocation6], 2048  }
   0xe   :  { %869 = vsyncadd [#allocation6], 4294965248  ;;  %vm86_vm0 = vcmask 523264   ;;  %v70_v0 = vld [vmem:[#allocation5] sm:$0xff]  ;;  %v72_v1 = vld [vmem:[#allocation5 + $0x10] sm:$0xff]  ;;  %vm303_vm1 = vcmask 64512  }
   0xf   :  { %v62_v2 = vld [vmem:[#allocation2] sm:$0xff]  ;;  %708 = vmatpush.xpose.msk.msra.mxu0 %vm86_vm0, %v70_v0  ;;  %712 = vmatpush.xpose.msk.msra.mxu2 %vm86_vm0, %v72_v1  ;;  %v64_v3 = vld [vmem:[#allocation2 + $0x10] sm:$0xff]  ;;  %v71_v5 = vld [vmem:[#allocation5 + $0x8] sm:$0xff]  ;;  %s877_s2 = smov [#allocation8]   ;;  %s694_s30 = sshll.u32 %s1042_s3, 4  ;;  %s695_s30 = int_to_ptr.hbm [resolvable:$true] %s694_s30 }
  0x10   :  { %v76_v4 = vld [vmem:[#allocation5 + $0x30] sm:$0xff]  ;;  %710 = vmatpush.xpose.msk.msra.mxu1 %vm86_vm0, %v71_v5  ;;  %v73_v6 = vld [vmem:[#allocation5 + $0x18] sm:$0xff]  ;;  %v63_v7 = vld [vmem:[#allocation2 + $0x8] sm:$0xff]  ;;  %s692_s27 = sshll.u32 %s877_s2, 4  ;;  %s693_s27 = int_to_ptr.vmem [resolvable:$true] %s692_s27 }
  0x11   :  { %714 = vmatpush.xpose.msk.msra.mxu3 %vm86_vm0, %v73_v6  ;;  %v65_v8 = vld [vmem:[#allocation2 + $0x18] sm:$0xff]  ;;  %v75_v10 = vld [vmem:[#allocation5 + $0x28] sm:$0xff]  ;;  %v74_v11 = vld [vmem:[#allocation5 + $0x20] sm:$0xff] }
  0x12   :  { %v77_v9 = vld [vmem:[#allocation5 + $0x38] sm:$0xff]  ;;  %709 = vmatmul.msk.f32.vlgmr.msra.gmra.mxu0 %vm86_vm0, %v62_v2  ;;  %713 = vmatmul.msk.f32.vlgmr.msra.gmra.mxu2 %vm86_vm0, %v64_v3  ;;  %v68_v12 = vld [vmem:[#allocation2 + $0x30] sm:$0xff]  ;;  %v66_v13 = vld [vmem:[#allocation2 + $0x20] sm:$0xff] }
  0x13   :  { %720 = vmatpush.xpose.msk.msrb.mxu2 %vm86_vm0, %v76_v4  ;;  %711 = vmatmul.msk.f32.vlgmr.msra.gmra.mxu1 %vm86_vm0, %v63_v7  ;;  %v67_v14 = vld [vmem:[#allocation2 + $0x28] sm:$0xff]  ;;  %v69_v15 = vld [vmem:[#allocation2 + $0x38] sm:$0xff] }
  0x14   :  { %715 = vmatmul.msk.f32.vlgmr.msra.gmra.mxu3 %vm86_vm0, %v65_v8  ;;  %718 = vmatpush.xpose.msk.msrb.mxu1 %vm86_vm0, %v75_v10 }
  0x15   :  { %722 = vmatpush.xpose.msk.msrb.mxu3 %vm86_vm0, %v77_v9  ;;  %716 = vmatpush.xpose.msk.msrb.mxu0 %vm86_vm0, %v74_v11 }
  0x1a   :  { %721 = vmatmul.msk.f32.vlgmr.msrb.gmra.mxu2 %vm86_vm0, %v68_v12  ;;  %717 = vmatmul.msk.f32.vlgmr.msrb.gmra.mxu0 %vm86_vm0, %v66_v13 }
  0x1b   :  { %719 = vmatmul.msk.f32.vlgmr.msrb.gmra.mxu1 %vm86_vm0, %v67_v14 }
  0x1c   :  { %723 = vmatmul.msk.f32.vlgmr.msrb.gmra.mxu3 %vm86_vm0, %v69_v15 }
  0x8f   :  { %v110_v16 = vpop.f32.mrf.mxu0 }
  0x90   :  { %v295_v17 = vmul.f32 0.125, %v110_v16  ;;  %v136_v18 = vpop.f32.mrf.mxu1  ;;  %v78_v16 = vld [vmem:[#allocation7] sm:$0xff] }
  0x91   :  { %v296_v20 = vmul.f32 0.125, %v136_v18  ;;  %514 = vmatpush.msra.mxu0 %v78_v16 }
  0x92   :  { %v304_v19 = vsel %vm303_vm1, %v295_v17, -inf }
  0x93   :  { %305 = vmax.xlane.f32.xlu1 %v304_v19  ;;  %v307_v25 = vsel %vm303_vm1, %v296_v20, -inf }
  0x95   :  { %v162_v21 = vpop.f32.mrf.mxu2 }
  0x96   :  { %v297_v22 = vmul.f32 0.125, %v162_v21  ;;  %v79_v21 = vld [vmem:[#allocation7 + $0x8] sm:$0xff] }
  0x97   :  { %v188_v23 = vpop.f32.mrf.mxu3  ;;  %v214_v32 = vpop.f32.mrf.mxu0  ;;  %537 = vmatpush.msra.mxu1 %v79_v21 }
  0x98   :  { %v310_v24 = vsel %vm303_vm1, %v297_v22, -inf  ;;  %v240_v26 = vpop.f32.mrf.mxu1  ;;  %v298_v27 = vmul.f32 0.125, %v188_v23  ;;  %v299_v36 = vmul.f32 0.125, %v214_v32 }
  0x99   :  { %311 = vmax.xlane.f32.xlu0 %v310_v24  ;;  %v300_v28 = vmul.f32 0.125, %v240_v26 }
  0x9a   :  { %v313_v31 = vsel %vm303_vm1, %v298_v27, -inf  ;;  %v316_v39 = vsel %vm303_vm1, %v299_v36, -inf }
  0x9b   :  { %308 = vmax.xlane.f32.xlu1 %v307_v25  ;;  %v319_v35 = vsel %vm303_vm1, %v300_v28, -inf }
  0x9d   :  { %v266_v29 = vpop.f32.mrf.mxu2 }
  0x9e   :  { %v301_v30 = vmul.f32 0.125, %v266_v29 }
  0x9f   :  { %v292_v33 = vpop.f32.mrf.mxu3 }
  0xa0   :  { %v322_v34 = vsel %vm303_vm1, %v301_v30, -inf  ;;  %v302_v37 = vmul.f32 0.125, %v292_v33  ;;  %v84_v33 = vld [vmem:[#allocation7 + $0x30] sm:$0xff] }
  0xa1   :  { %314 = vmax.xlane.f32.xlu0 %v313_v31  ;;  %323 = vmax.xlane.f32.xlu2 %v322_v34  ;;  %v85_v34 = vld [vmem:[#allocation7 + $0x38] sm:$0xff] }
  0xa2   :  { %v325_v38 = vsel %vm303_vm1, %v302_v37, -inf }
  0xa3   :  { %320 = vmax.xlane.f32.xlu1 %v319_v35  ;;  %v82_v35 = vld [vmem:[#allocation7 + $0x20] sm:$0xff] }
  0xa4   :  { %606 = vmatpush.msrb.mxu0 %v82_v35 }
  0xa9   :  { %326 = vmax.xlane.f32.xlu2 %v325_v38  ;;  %317 = vmax.xlane.f32.xlu0 %v316_v39  ;;  %v83_v39 = vld [vmem:[#allocation7 + $0x28] sm:$0xff] }
  0xaa   :  { %629 = vmatpush.msrb.mxu1 %v83_v39 }
 0x106   :  { %v306_v40 = vpop.xlane.xlu1 %305 }
 0x107   :  { %v328_v41 = vsub.f32 %v295_v17, %v306_v40  ;;  %v80_v17 = vld [vmem:[#allocation7 + $0x10] sm:$0xff] }
 0x108   :  { %560 = vmatpush.msra.mxu2 %v80_v17 }
 0x109   :  { %v336_v42 = vmul.f32 1.442695, %v328_v41 }
 0x10a   :  { %652 = vmatpush.msrb.mxu2 %v84_v33 }
 0x10b   :  { %738 = vpow2.f32 %v336_v42 }
 0x10c   :  { %v312_v43 = vpop.xlane.xlu0 %311 }
 0x10d   :  { %v330_v44 = vsub.f32 %v297_v22, %v312_v43 }
 0x10e   :  { %v309_v45 = vpop.xlane.xlu1 %308 }
 0x10f   :  { %v340_v46 = vmul.f32 1.442695, %v330_v44  ;;  %v329_v47 = vsub.f32 %v296_v20, %v309_v45  ;;  %v81_v20 = vld [vmem:[#allocation7 + $0x18] sm:$0xff] }
 0x110   :  { %583 = vmatpush.msra.mxu3 %v81_v20 }
 0x111   :  { %v940_v48 = vpop.eup %738  ;;  %740 = vpow2.f32 %v340_v46  ;;  %v338_v50 = vmul.f32 1.442695, %v329_v47 }
 0x112   :  { %v352_v49 = vsel %vm303_vm1, %v940_v48, 0.0  ;;  %675 = vmatpush.msrb.mxu3 %v85_v34 }
 0x113   :  { %353 = vadd.xlane.f32.xlu1 %v352_v49  ;;  %742 = vpow2.f32 %v338_v50 }
 0x114   :  { %v315_v51 = vpop.xlane.xlu0 %314  ;;  %v324_v52 = vpop.xlane.xlu2 %323 }
 0x115   :  { %v331_v53 = vsub.f32 %v298_v27, %v315_v51  ;;  %v334_v56 = vsub.f32 %v301_v30, %v324_v52 }
 0x116   :  { %v321_v59 = vpop.xlane.xlu1 %320 }
 0x117   :  { %v944_v54 = vpop.eup %740  ;;  %v342_v55 = vmul.f32 1.442695, %v331_v53  ;;  %v348_v58 = vmul.f32 1.442695, %v334_v56  ;;  %v333_v2 = vsub.f32 %v300_v28, %v321_v59 }
 0x118   :  { %v358_v57 = vsel %vm303_vm1, %v944_v54, 0.0 }
 0x119   :  { %744 = vpow2.f32 %v342_v55  ;;  %359 = vadd.xlane.f32.xlu2 %v358_v57  ;;  %v948_v62 = vpop.eup %742  ;;  %v346_v7 = vmul.f32 1.442695, %v333_v2 }
 0x11a   :  { %746 = vpow2.f32 %v348_v58  ;;  %v355_v5 = vsel %vm303_vm1, %v948_v62, 0.0 }
 0x11c   :  { %v327_v60 = vpop.xlane.xlu2 %326  ;;  %v318_v61 = vpop.xlane.xlu0 %317 }
 0x11d   :  { %v335_v63 = vsub.f32 %v302_v37, %v327_v60  ;;  %v332_v0 = vsub.f32 %v299_v36, %v318_v61 }
 0x11f   :  { %v950_v1 = vpop.eup %744  ;;  %v350_v3 = vmul.f32 1.442695, %v335_v63  ;;  %v344_v4 = vmul.f32 1.442695, %v332_v0 }
 0x120   :  { %v361_v6 = vsel %vm303_vm1, %v950_v1, 0.0  ;;  %v956_v8 = vpop.eup %746 }
 0x121   :  { %748 = vpow2.f32 %v350_v3  ;;  %356 = vadd.xlane.f32.xlu2 %v355_v5  ;;  %362 = vadd.xlane.f32.xlu0 %v361_v6  ;;  %v370_v12 = vsel %vm303_vm1, %v956_v8, 0.0 }
 0x122   :  { %750 = vpow2.f32 %v344_v4 }
 0x123   :  { %752 = vpow2.f32 %v346_v7 }
 0x127   :  { %v958_v9 = vpop.eup %748 }
 0x128   :  { %v960_v10 = vpop.eup %750  ;;  %v373_v11 = vsel %vm303_vm1, %v958_v9, 0.0 }
 0x129   :  { %374 = vadd.xlane.f32.xlu1 %v373_v11  ;;  %371 = vadd.xlane.f32.xlu0 %v370_v12  ;;  %v364_v13 = vsel %vm303_vm1, %v960_v10, 0.0  ;;  %v968_v14 = vpop.eup %752 }
 0x12a   :  { %365 = vadd.xlane.f32.xlu2 %v364_v13  ;;  %v367_v15 = vsel %vm303_vm1, %v968_v14, 0.0 }
 0x131   :  { %368 = vadd.xlane.f32.xlu0 %v367_v15 }
 0x186   :  { %v354_v18 = vpop.xlane.xlu1 %353 }
 0x187   :  { %754 = vrcp.f32 %v354_v18  ;;  %v387_v25 = vand.u32 2147483648, %v354_v18  ;;  %v385_v27 = vand.u32 2147483647, %v354_v18  ;;  %vm381_vm3 = vweird.f32 %v354_v18 }
 0x189   :  { %v388_v36 = vor.u32 1.1754944e-38, %v387_v25  ;;  %vm386_vm5 = vcmp.eq.f32.partialorder %v385_v27, 8.507059e+37 }
 0x18c   :  { %v360_v19 = vpop.xlane.xlu2 %359 }
 0x18d   :  { %v755_v22 = vpop.eup %754  ;;  %756 = vrcp.f32 %v360_v19  ;;  %v413_v44 = vand.u32 2147483647, %v360_v19  ;;  %v415_v45 = vand.u32 2147483648, %v360_v19  ;;  %vm409_vm7 = vweird.f32 %v360_v19 }
 0x18e   :  { %v377_v23 = vmul.f32 %v755_v22, %v354_v18  ;;  %vm382_vm2 = vweird.f32 %v755_v22 }
 0x18f   :  { %vm383_vm4 = vmor %vm381_vm3, %vm382_vm2  ;;  %vm414_vm9 = vcmp.eq.f32.partialorder %v413_v44, 8.507059e+37  ;;  %v416_v56 = vor.u32 1.1754944e-38, %v415_v45 }
 0x190   :  { %v378_v24 = vsub.f32 1.0, %v377_v23 }
 0x192   :  { %v379_v26 = vmul.f32 %v755_v22, %v378_v24 }
 0x193   :  { %v757_v28 = vpop.eup %756 }
 0x194   :  { %v380_v29 = vadd.f32 %v755_v22, %v379_v26  ;;  %v405_v30 = vmul.f32 %v757_v28, %v360_v19  ;;  %v357_v31 = vpop.xlane.xlu2 %356  ;;  %v363_v32 = vpop.xlane.xlu0 %362  ;;  %vm410_vm6 = vweird.f32 %v757_v28 }
 0x195   :  { %758 = vrcp.f32 %v357_v31  ;;  %vm974_vm8 = vmor %vm409_vm7, %vm410_vm6  ;;  %v399_v58 = vand.u32 2147483647, %v357_v31  ;;  %v401_v59 = vand.u32 2147483648, %v357_v31  ;;  %v427_v61 = vand.u32 2147483647, %v363_v32 }
 0x196   :  { %v384_v37 = vsel %vm383_vm4, %v755_v22, %v380_v29  ;;  %v406_v38 = vsub.f32 1.0, %v405_v30  ;;  %760 = vrcp.f32 %v363_v32  ;;  %v429_v2 = vand.u32 2147483648, %v363_v32 }
 0x197   :  { %v389_v40 = vsel %vm386_vm5, %v388_v36, %v384_v37  ;;  %vm395_vm12 = vweird.f32 %v357_v31  ;;  %vm423_vm13 = vweird.f32 %v363_v32  ;;  %vm400_vm15 = vcmp.eq.f32.partialorder %v399_v58, 8.507059e+37 }
 0x198   :  { %v407_v41 = vmul.f32 %v757_v28, %v406_v38  ;;  %v488_v42 = vmul.f32 %v940_v48, %v389_v40  ;;  %v402_v6 = vor.u32 1.1754944e-38, %v401_v59  ;;  %vm428_vm2 = vcmp.eq.f32.partialorder %v427_v61, 8.507059e+37 }
 0x199   :  { %v430_v13 = vor.u32 1.1754944e-38, %v429_v2 }
 0x19a   :  { %v408_v43 = vadd.f32 %v757_v28, %v407_v41  ;;  %724 = vmatmul.msk.f32.vlgmr.msra.gmra.mxu0 %vm303_vm1, %v488_v42 }
 0x19b   :  { %v759_v46 = vpop.eup %758 }
 0x19c   :  { %v761_v47 = vpop.eup %760  ;;  %v391_v50 = vmul.f32 %v759_v46, %v357_v31  ;;  %v978_v51 = vpop.xlane.xlu1 %374  ;;  %v412_v48 = vsel %vm974_vm8, %v757_v28, %v408_v43  ;;  %vm396_vm10 = vweird.f32 %v759_v46 }
 0x19d   :  { %v980_v52 = vpop.xlane.xlu0 %371  ;;  %v419_v53 = vmul.f32 %v761_v47, %v363_v32  ;;  %762 = vrcp.f32 %v978_v51  ;;  %v985_v55 = vpop.xlane.xlu2 %365  ;;  %v417_v63 = vsel %vm414_vm9, %v416_v56, %v412_v48  ;;  %vm424_vm11 = vweird.f32 %v761_v47  ;;  %vm397_vm14 = vmor %vm395_vm12, %vm396_vm10 }
 0x19e   :  { %v392_v57 = vsub.f32 1.0, %v391_v50  ;;  %764 = vrcp.f32 %v985_v55  ;;  %v490_v11 = vmul.f32 %v944_v54, %v417_v63  ;;  %vm425_vm0 = vmor %vm423_vm13, %vm424_vm11  ;;  %vm479_vm3 = vweird.f32 %v978_v51 }
 0x19f   :  { %v420_v60 = vsub.f32 1.0, %v419_v53  ;;  %766 = vrcp.f32 %v980_v52  ;;  %v483_v54 = vand.u32 2147483647, %v978_v51  ;;  %v485_v24 = vand.u32 2147483648, %v978_v51 }
 0x1a0   :  { %v393_v0 = vmul.f32 %v759_v46, %v392_v57  ;;  %726 = vmatmul.msk.f32.vlgmr.msra.gmra.mxu2 %vm303_vm1, %v490_v11  ;;  %vm437_vm4 = vweird.f32 %v985_v55  ;;  %v441_v25 = vand.u32 2147483647, %v985_v55  ;;  %v443_v30 = vand.u32 2147483648, %v985_v55 }
 0x1a1   :  { %v421_v3 = vmul.f32 %v761_v47, %v420_v60  ;;  %v469_v31 = vand.u32 2147483647, %v980_v52  ;;  %v471_v32 = vand.u32 2147483648, %v980_v52  ;;  %vm484_vm8 = vcmp.eq.f32.partialorder %v483_v54, 8.507059e+37 }
 0x1a2   :  { %v394_v4 = vadd.f32 %v759_v46, %v393_v0  ;;  %v486_v37 = vor.u32 1.1754944e-38, %v485_v24  ;;  %vm1010_vm9 = vcmp.eq.f32.partialorder %v441_v25, 8.507059e+37  ;;  %v444_v43 = vor.u32 1.1754944e-38, %v443_v30 }
 0x1a3   :  { %v763_v5 = vpop.eup %762  ;;  %v422_v7 = vadd.f32 %v761_v47, %v421_v3  ;;  %vm465_vm12 = vweird.f32 %v980_v52  ;;  %vm470_vm13 = vcmp.eq.f32.partialorder %v469_v31, 8.507059e+37 }
 0x1a4   :  { %v398_v12 = vsel %vm397_vm14, %v759_v46, %v394_v4  ;;  %v475_v15 = vmul.f32 %v763_v5, %v978_v51  ;;  %v765_v17 = vpop.eup %764  ;;  %vm480_vm5 = vweird.f32 %v763_v5  ;;  %v472_v46 = vor.u32 1.1754944e-38, %v471_v32 }
 0x1a5   :  { %v991_v16 = vpop.xlane.xlu0 %368  ;;  %v403_v18 = vsel %vm400_vm15, %v402_v6, %v398_v12  ;;  %v426_v19 = vsel %vm425_vm0, %v761_v47, %v422_v7  ;;  %v433_v22 = vmul.f32 %v765_v17, %v985_v55  ;;  %v767_v23 = vpop.eup %766  ;;  %vm438_vm6 = vweird.f32 %v765_v17  ;;  %vm481_vm7 = vmor %vm479_vm3, %vm480_vm5 }
 0x1a6   :  { %768 = vrcp.f32 %v991_v16  ;;  %v431_v20 = vsel %vm428_vm2, %v430_v13, %v426_v19  ;;  %v476_v21 = vsub.f32 1.0, %v475_v15  ;;  %v489_v26 = vmul.f32 %v948_v62, %v403_v18  ;;  %vm439_vm11 = vmor %vm437_vm4, %vm438_vm6 }
 0x1a7   :  { %v434_v28 = vsub.f32 1.0, %v433_v22  ;;  %v461_v29 = vmul.f32 %v767_v23, %v980_v52  ;;  %v491_v33 = vmul.f32 %v950_v1, %v431_v20  ;;  %vm466_vm10 = vweird.f32 %v767_v23 }
 0x1a8   :  { %v477_v27 = vmul.f32 %v763_v5, %v476_v21  ;;  %725 = vmatmul.msk.f32.vlgmr.msra.gmra.mxu1 %vm303_vm1, %v489_v26  ;;  %vm467_vm14 = vmor %vm465_vm12, %vm466_vm10  ;;  %v455_v51 = vand.u32 2147483647, %v991_v16  ;;  %v457_v48 = vand.u32 2147483648, %v991_v16  ;;  %vm451_vm0 = vweird.f32 %v991_v16 }
 0x1a9   :  { %v435_v35 = vmul.f32 %v765_v17, %v434_v28  ;;  %v462_v36 = vsub.f32 1.0, %v461_v29  ;;  %727 = vmatmul.msk.f32.vlgmr.msra.gmra.mxu3 %vm303_vm1, %v491_v33 }
 0x1aa   :  { %v478_v34 = vadd.f32 %v763_v5, %v477_v27  ;;  %v458_v58 = vor.u32 1.1754944e-38, %v457_v48  ;;  %vm456_vm3 = vcmp.eq.f32.partialorder %v455_v51, 8.507059e+37 }
 0x1ab   :  { %v436_v40 = vadd.f32 %v765_v17, %v435_v35  ;;  %v463_v1 = vmul.f32 %v767_v23, %v462_v36 }
 0x1ac   :  { %v769_v62 = vpop.eup %768  ;;  %v482_v39 = vsel %vm481_vm7, %v763_v5, %v478_v34 }
 0x1ad   :  { %v447_v41 = vmul.f32 %v769_v62, %v991_v16  ;;  %v487_v42 = vsel %vm484_vm8, %v486_v37, %v482_v39  ;;  %v440_v44 = vsel %vm439_vm11, %v765_v17, %v436_v40  ;;  %v464_v45 = vadd.f32 %v767_v23, %v463_v1 }
 0x1ae   :  { %v495_v49 = vmul.f32 %v958_v9, %v487_v42  ;;  %v445_v50 = vsel %vm1010_vm9, %v444_v43, %v440_v44  ;;  %vm452_vm15 = vweird.f32 %v769_v62 }
 0x1af   :  { %v448_v47 = vsub.f32 1.0, %v447_v41  ;;  %v492_v53 = vmul.f32 %v960_v10, %v445_v50  ;;  %v468_v55 = vsel %vm467_vm14, %v767_v23, %v464_v45  ;;  %vm453_vm2 = vmor %vm451_vm0, %vm452_vm15 }
 0x1b0   :  { %v473_v56 = vsel %vm470_vm13, %v472_v46, %v468_v55 }
 0x1b1   :  { %v449_v52 = vmul.f32 %v769_v62, %v448_v47  ;;  %728 = vmatmul.msk.f32.vlgmr.msrb.gmra.mxu0 %vm303_vm1, %v492_v53  ;;  %v494_v9 = vmul.f32 %v956_v8, %v473_v56  ;;  %731 = vmatmul.msk.f32.vlgmr.msrb.gmra.mxu3 %vm303_vm1, %v495_v49 }
 0x1b3   :  { %v450_v57 = vadd.f32 %v769_v62, %v449_v52  ;;  %730 = vmatmul.msk.f32.vlgmr.msrb.gmra.mxu2 %vm303_vm1, %v494_v9 }
 0x1b5   :  { %v454_v59 = vsel %vm453_vm2, %v769_v62, %v450_v57 }
 0x1b6   :  { %v459_v10 = vsel %vm456_vm3, %v458_v58, %v454_v59 }
 0x1b7   :  { %v493_v60 = vmul.f32 %v968_v14, %v459_v10 }
 0x1b9   :  { %729 = vmatmul.msk.f32.vlgmr.msrb.gmra.mxu1 %vm303_vm1, %v493_v60 }
 0x217   :  { %v516_v61 = vpop.f32.mrf.mxu0 }
 0x218   :  { %680 = vst [vmem:[#allocation8] sm:$0xff] %v516_v61 }
 0x223   :  { %v562_v0 = vpop.f32.mrf.mxu2 }
 0x224   :  { %682 = vst [vmem:[#allocation8 + $0x10] sm:$0xff] %v562_v0 }
 0x225   :  { %v539_v63 = vpop.f32.mrf.mxu1 }
 0x226   :  { %681 = vst [vmem:[#allocation8 + $0x8] sm:$0xff] %v539_v63 }
 0x22c   :  { %v585_v8 = vpop.f32.mrf.mxu3 }
 0x22d   :  { %683 = vst [vmem:[#allocation8 + $0x18] sm:$0xff] %v585_v8 }
 0x22e   :  { %v608_v2 = vpop.f32.mrf.mxu0 }
 0x22f   :  { %684 = vst [vmem:[#allocation8 + $0x20] sm:$0xff] %v608_v2 }
 0x234   :  { %v677_v14 = vpop.f32.mrf.mxu3 }
 0x235   :  { %687 = vst [vmem:[#allocation8 + $0x38] sm:$0xff] %v677_v14 }
 0x236   :  { %v631_v3 = vpop.f32.mrf.mxu1  ;;  %v654_v4 = vpop.f32.mrf.mxu2 }
 0x237   :  { %685 = vst [vmem:[#allocation8 + $0x28] sm:$0xff] %v631_v3 }
 0x238   :  { %686 = vst [vmem:[#allocation8 + $0x30] sm:$0xff] %v654_v4 }
 0x239   :  { %700 = dma.vmem_to_hbm [thread:$0]  %s693_s27, 1024, %s695_s30, [#allocation4], %s873_s20, %s873_s20, %s874_s21  }
 0x23a   :  { %870 = dma.done.wait [#allocation4], 1024  }
 0x23b   :  { %871 = vsyncadd [#allocation4], 4294966272 }
 0x23c   :  { %705 = vsyncpa [#allocation3], 1 }
 0x23d   :  { %706 = vsyncpa [#allocation6], 1 }
 0x23e   :  { %707 = vsyncpa [#allocation4], 1 }

</bundles_post_ra>
